<compile_context>
chip_gen: v5e
topology: v5e:2x2
jax: 0.10.0
libtpu: 0.0.40
codegen_flags: <defaults>
</compile_context>

<pallas_src>
import functools

import jax
import jax.numpy as jnp
from jax.experimental import pallas as pl
from jax.experimental.pallas import tpu as pltpu

BN_EPS = 1e-5
LEAKY_SLOPE = 0.01
DROPOUT_P = 0.4
KEEP_SCALE = 1.0 / (1.0 - DROPOUT_P)
# keep iff uint16 random bits >= threshold  =>  P(keep) = (65536 - 26214)/65536 ~= 0.600006
DROP_THRESHOLD_U16 = int(DROPOUT_P * (1 << 16))  # 26214


def _round_up(v, m):
    return (v + m - 1) // m * m


def _vmem_limit_bytes(n, k_pad, t_f, training):
    """Explicit scoped-VMEM budget derived from the actual padded buffers."""
    x_b = n * k_pad * 2                   # bf16, VMEM-resident across feature steps
    w_b = k_pad * t_f * 2                 # bf16 weight tile
    aff_b = 2 * t_f * 4                   # gamma + beta tiles (f32)
    bits_b = n * t_f * 2 if training else 0
    out_b = n * t_f * 4
    est = 2 * (x_b + w_b + aff_b + bits_b + out_b)   # double-buffered pipeline
    return int(min(max(est + (4 << 20), 32 << 20), 100 << 20))


def _basic_block_kernel(x_ref, w_ref, gamma_ref, beta_ref, *rest, apply_dropout):
    if apply_dropout:
        bits_ref, o_ref = rest
    else:
        (o_ref,) = rest

    # ---- Linear: bf16 MXU feed, f32 accumulate.  (Bias omitted: training-mode BN
    #      subtracts the batch mean, exactly cancelling any per-feature constant.) ----
    y = jnp.dot(x_ref[...], w_ref[...], preferred_element_type=jnp.float32)  # (N, tF)

    # ---- BatchNorm1d (training mode: batch statistics, biased variance) ----
    mean = jnp.mean(y, axis=0, keepdims=True)
    centered = y - mean
    var = jnp.mean(centered * centered, axis=0, keepdims=True)
    y = centered * jax.lax.rsqrt(var + BN_EPS)
    # gamma/beta carry the inverted-dropout KEEP_SCALE pre-folded in when training
    # (valid because LeakyReLU is positively homogeneous).
    y = y * gamma_ref[...] + beta_ref[...]

    # ---- LeakyReLU (negative_slope = 0.01) ----
    y = jnp.maximum(y, LEAKY_SLOPE * y)

    # ---- Dropout(p=0.4): single select-to-zero (scaling already folded in) ----
    if apply_dropout:
        keep = bits_ref[...].astype(jnp.int32) >= DROP_THRESHOLD_U16
        y = jnp.where(keep, y, 0.0)

    o_ref[...] = y.astype(o_ref.dtype)


def prepare_params(weight, bias, gamma, beta, *, training=True):
    """One-time (per parameter update) prep: pad to lane-dense 128-multiples,
    pre-transpose the weight to (Kp, Fp), cast to bf16, fold KEEP_SCALE into the
    BN affine.  Keep this OUT of the per-call hot path.

    `bias` is accepted for API parity but is mathematically cancelled by the
    training-mode BatchNorm mean subtraction, so it is not sent to the kernel.
    """
    del bias
    d_out, d_in = weight.shape
    k_pad = _round_up(d_in, 128)
    f_pad = _round_up(d_out, 128)

    w_p = jnp.pad(weight, ((0, f_pad - d_out), (0, k_pad - d_in)))   # (Fp, Kp)
    w_t = jnp.transpose(w_p).astype(jnp.bfloat16)                    # (Kp, Fp) MXU feed

    scale = KEEP_SCALE if training else 1.0
    g_p = (jnp.pad(gamma, (0, f_pad - d_out), constant_values=1.0) * scale)
    b_p = (jnp.pad(beta, (0, f_pad - d_out)) * scale)
    return (w_t,
            g_p.reshape(1, f_pad).astype(jnp.float32),
            b_p.reshape(1, f_pad).astype(jnp.float32))


def basic_block_forward(x, params, key, *, d_out, training=True):
    """x: (N, D_in) f32.  params: output of prepare_params.  Returns (N, d_out) f32."""
    w_t, g_p, b_p = params
    n, d_in = x.shape
    k_pad, f_pad = w_t.shape
    # 256-wide feature tiles fill the v6e/v7x 256x256 MXU; fall back to 128 (v5e-native).
    t_f = 256 if f_pad % 256 == 0 else 128

    x_p = jnp.pad(x, ((0, 0), (0, k_pad - d_in))).astype(jnp.bfloat16)  # (N, Kp)

    in_specs = [
        pl.BlockSpec((n, k_pad), lambda j: (0, 0)),    # x: constant -> VMEM-resident
        pl.BlockSpec((k_pad, t_f), lambda j: (0, j)),  # pre-transposed weight tile
        pl.BlockSpec((1, t_f), lambda j: (0, j)),      # gamma (KEEP_SCALE folded)
        pl.BlockSpec((1, t_f), lambda j: (0, j)),      # beta  (KEEP_SCALE folded)
    ]
    args = [x_p, w_t, g_p, b_p]
    if training:
        # Dropout bits generated XLA-side (same Bernoulli(0.6) keep distribution as
        # torch; cannot bit-match torch's RNG stream).  uint16 halves the stream.
        bits = jax.random.bits(key, (n, f_pad), dtype=jnp.uint16)
        in_specs.append(pl.BlockSpec((n, t_f), lambda j: (0, j)))
        args.append(bits)

    kernel = functools.partial(_basic_block_kernel, apply_dropout=training)

    out_p = pl.pallas_call(
        kernel,
        out_shape=jax.ShapeDtypeStruct((n, f_pad), jnp.float32),
        grid=(f_pad // t_f,),
        in_specs=in_specs,
        out_specs=pl.BlockSpec((n, t_f), lambda j: (0, j)),
        compiler_params=pltpu.CompilerParams(
            dimension_semantics=("parallel",),
            vmem_limit_bytes=_vmem_limit_bytes(n, k_pad, t_f, training)),
    )(*args)

    return out_p[:, :d_out]


if __name__ == "__main__":
    input_dim = 39     # matches the original script's `input_dim = 39`
    output_dim = 32
    batch = 8

    key = jax.random.PRNGKey(0)
    kx, kw, kb, kdrop = jax.random.split(key, 4)

    # Deterministic parameter init mimicking PyTorch defaults:
    #   Linear: U(-1/sqrt(fan_in), 1/sqrt(fan_in));  BatchNorm: gamma=1, beta=0.
    bound = 1.0 / jnp.sqrt(jnp.float32(input_dim))
    weight = jax.random.uniform(kw, (output_dim, input_dim), jnp.float32, -bound, bound)
    bias = jax.random.uniform(kb, (output_dim,), jnp.float32, -bound, bound)
    gamma = jnp.ones((output_dim,), jnp.float32)
    beta = jnp.zeros((output_dim,), jnp.float32)

    x = jax.random.normal(kx, (batch, input_dim), jnp.float32)

    # Parameter prep (pad / transpose / bf16 / scale-fold) done once, off the hot path.
    params = prepare_params(weight, bias, gamma, beta, training=True)

    out = basic_block_forward(x, params, kdrop, d_out=output_dim, training=True)
    out = jax.block_until_ready(out)

    assert out.shape == (batch, output_dim)
    assert bool(jnp.all(jnp.isfinite(out)))
    print("KERNEL_OK")
</pallas_src>

<mosaic_0001>
module attributes {stable_mosaic.version = 11 : i64} {
  func.func @_basic_block_kernel(%arg0: i32, %arg1: memref<8x128xbf16, #tpu.memory_space<vmem>>, %arg2: memref<128x128xbf16, #tpu.memory_space<vmem>>, %arg3: memref<1x128xf32, #tpu.memory_space<vmem>>, %arg4: memref<1x128xf32, #tpu.memory_space<vmem>>, %arg5: memref<8x128xi16, #tpu.memory_space<vmem>>, %arg6: memref<8x128xf32, #tpu.memory_space<vmem>>) attributes {dimension_semantics = [#tpu.dimension_semantics<parallel>], iteration_bounds = array<i64: 1>, scalar_prefetch = 0 : i64, scratch_operands = 0 : i64, tpu.core_type = #tpu.core_type<tc>, window_params = [{pipeline_mode = #tpu.pipeline_mode<synchronous>, transform_indices = @transform_0, window_bounds = array<i64: 8, 128>}, {transform_indices = @transform_1, window_bounds = array<i64: 128, 128>}, {transform_indices = @transform_2, window_bounds = array<i64: 1, 128>}, {transform_indices = @transform_3, window_bounds = array<i64: 1, 128>}, {transform_indices = @transform_4, window_bounds = array<i64: 8, 128>}, {transform_indices = @transform_5, window_bounds = array<i64: 8, 128>}]} {
    %c0 = arith.constant 0 : index
    %c0_0 = arith.constant 0 : index
    %0 = vector.load %arg1[%c0, %c0_0] : memref<8x128xbf16, #tpu.memory_space<vmem>>, vector<8x128xbf16>
    %c0_1 = arith.constant 0 : index
    %c0_2 = arith.constant 0 : index
    %1 = vector.load %arg2[%c0_1, %c0_2] : memref<128x128xbf16, #tpu.memory_space<vmem>>, vector<128x128xbf16>
    %cst = arith.constant dense<0.000000e+00> : vector<8x128xf32>
    %2 = tpu.matmul %0, %1, %cst {dimension_numbers = #tpu.dot_dimension_numbers<[1], [0], [0], [1], [0, 0, 1, 1], [], []>} : vector<8x128xbf16>, vector<128x128xbf16>, vector<8x128xf32> -> vector<8x128xf32>
    %cst_3 = arith.constant dense<0.000000e+00> : vector<128xf32>
    %3 = vector.multi_reduction <add>, %2, %cst_3 [0] : vector<8x128xf32> to vector<128xf32>
    %4 = vector.shape_cast %3 : vector<128xf32> to vector<1x128xf32>
    %cst_4 = arith.constant 8.000000e+00 : f32
    %5 = vector.broadcast %cst_4 : f32 to vector<1x128xf32>
    %6 = arith.divf %4, %5 : vector<1x128xf32>
    %7 = vector.broadcast %6 : vector<1x128xf32> to vector<8x128xf32>
    %8 = arith.subf %2, %7 : vector<8x128xf32>
    %9 = arith.mulf %8, %8 : vector<8x128xf32>
    %cst_5 = arith.constant dense<0.000000e+00> : vector<128xf32>
    %10 = vector.multi_reduction <add>, %9, %cst_5 [0] : vector<8x128xf32> to vector<128xf32>
    %11 = vector.shape_cast %10 : vector<128xf32> to vector<1x128xf32>
    %cst_6 = arith.constant 8.000000e+00 : f32
    %12 = vector.broadcast %cst_6 : f32 to vector<1x128xf32>
    %13 = arith.divf %11, %12 : vector<1x128xf32>
    %cst_7 = arith.constant 9.99999974E-6 : f32
    %14 = vector.broadcast %cst_7 : f32 to vector<1x128xf32>
    %15 = arith.addf %13, %14 : vector<1x128xf32>
    %16 = math.rsqrt %15 : vector<1x128xf32>
    %17 = vector.broadcast %16 : vector<1x128xf32> to vector<8x128xf32>
    %18 = arith.mulf %8, %17 : vector<8x128xf32>
    %c0_8 = arith.constant 0 : index
    %c0_9 = arith.constant 0 : index
    %19 = vector.load %arg3[%c0_8, %c0_9] : memref<1x128xf32, #tpu.memory_space<vmem>>, vector<1x128xf32>
    %20 = vector.broadcast %19 : vector<1x128xf32> to vector<8x128xf32>
    %21 = arith.mulf %18, %20 : vector<8x128xf32>
    %c0_10 = arith.constant 0 : index
    %c0_11 = arith.constant 0 : index
    %22 = vector.load %arg4[%c0_10, %c0_11] : memref<1x128xf32, #tpu.memory_space<vmem>>, vector<1x128xf32>
    %23 = vector.broadcast %22 : vector<1x128xf32> to vector<8x128xf32>
    %24 = arith.addf %21, %23 : vector<8x128xf32>
    %cst_12 = arith.constant 0.00999999977 : f32
    %25 = vector.broadcast %cst_12 : f32 to vector<8x128xf32>
    %26 = arith.mulf %25, %24 : vector<8x128xf32>
    %27 = arith.maximumf %24, %26 : vector<8x128xf32>
    %c0_13 = arith.constant 0 : index
    %c0_14 = arith.constant 0 : index
    %28 = vector.load %arg5[%c0_13, %c0_14] : memref<8x128xi16, #tpu.memory_space<vmem>>, vector<8x128xi16>
    %29 = arith.extui %28 : vector<8x128xi16> to vector<8x128xi32>
    %c26214_i32 = arith.constant 26214 : i32
    %30 = vector.broadcast %c26214_i32 : i32 to vector<8x128xi32>
    %31 = arith.cmpi sge, %29, %30 : vector<8x128xi32>
    %cst_15 = arith.constant 0.000000e+00 : f32
    %32 = vector.broadcast %cst_15 : f32 to vector<8x128xf32>
    %33 = arith.select %31, %27, %32 : vector<8x128xi1>, vector<8x128xf32>
    %c0_16 = arith.constant 0 : index
    %c0_17 = arith.constant 0 : index
    %34 = vector.load %arg6[%c0_16, %c0_17] : memref<8x128xf32, #tpu.memory_space<vmem>>, vector<8x128xf32>
    tpu.vector_store %arg6[%c0_16, %c0_17], %33 {strides = array<i32>} : memref<8x128xf32, #tpu.memory_space<vmem>>, vector<8x128xf32>,
    return
  }
  func.func @transform_0(%arg0: i32) -> (i32, i32) {
    %c0_i32 = arith.constant 0 : i32
    %c0_i32_0 = arith.constant 0 : i32
    %c0_i32_1 = arith.constant 0 : i32
    return %c0_i32, %c0_i32_0 : i32, i32
  }
  func.func @transform_1(%arg0: i32) -> (i32, i32) {
    %c0_i32 = arith.constant 0 : i32
    %c0_i32_0 = arith.constant 0 : i32
    return %c0_i32, %arg0 : i32, i32
  }
  func.func @transform_2(%arg0: i32) -> (i32, i32) {
    %c0_i32 = arith.constant 0 : i32
    %c0_i32_0 = arith.constant 0 : i32
    return %c0_i32, %arg0 : i32, i32
  }
  func.func @transform_3(%arg0: i32) -> (i32, i32) {
    %c0_i32 = arith.constant 0 : i32
    %c0_i32_0 = arith.constant 0 : i32
    return %c0_i32, %arg0 : i32, i32
  }
  func.func @transform_4(%arg0: i32) -> (i32, i32) {
    %c0_i32 = arith.constant 0 : i32
    %c0_i32_0 = arith.constant 0 : i32
    return %c0_i32, %arg0 : i32, i32
  }
  func.func @transform_5(%arg0: i32) -> (i32, i32) {
    %c0_i32 = arith.constant 0 : i32
    %c0_i32_0 = arith.constant 0 : i32
    return %c0_i32, %arg0 : i32, i32
  }
}

</mosaic_0001>

<bundles_post_ra>
// kernel: tpu_custom_call.1
= control target key start
LH: loop header
LB: loop body
LE: loop exit
PB: predicated region body
PF: predicated region fallthrough
CT: control target
= control target key end

     0   :  { %10 = vsyncpa [#allocation3], 0  ;;  %s423_s0 = inlined_call_operand.hbm [shape: bf16[8,128], index: 0, kind: input, shape index: {}]   ;;  %s424_s1 = inlined_call_operand.hbm [shape: bf16[128,128], index: 1, kind: input, shape index: {}]   ;;  %s425_s2 = inlined_call_operand.vmem [shape: f32[1,128], index: 2, kind: input, shape index: {}]   ;;  %s426_s3 = inlined_call_operand.vmem [shape: f32[1,128], index: 3, kind: input, shape index: {}]   ;;  %s427_s4 = inlined_call_operand.hbm [shape: u16[8,128], index: 4, kind: input, shape index: {}]   ;;  %s428_s5 = inlined_call_operand.hbm [shape: f32[8,128], index: 5, kind: output, shape index: {}]  }
   0x1   :  { %11 = vsyncpa [#allocation6], 0  ;;  %s28_s20 = sshll.u32 %s424_s1, 4  ;;  %s29_s20 = int_to_ptr.hbm [resolvable:$true] %s28_s20 }
   0x2   :  { %12 = vsyncpa [#allocation4], 0  ;;  %s368_s21 = smov [#allocation5]   ;;  %s18_s25 = sshll.u32 %s423_s0, 4  ;;  %s19_s25 = int_to_ptr.hbm [resolvable:$true] %s18_s25 }
   0x3   :  { %s30_s22 = sshll.u32 %s368_s21, 4  ;;  %s369_s26 = smov 64   ;;  %s31_s22 = int_to_ptr.vmem [resolvable:$true] %s30_s22 }
   0x4   :  { %s370_s27 = smov 4   ;;  %s371_s28 = smov [#allocation2]  }
   0x5   :  { %36 = dma.hbm_to_vmem [thread:$0]  %s29_s20, 1024, %s31_s22, [#allocation6], %s369_s26, %s369_s26, %s370_s27  }
   0x6   :  { %s20_s29 = sshll.u32 %s371_s28, 4  ;;  %s46_s7 = sshll.u32 %s427_s4, 4  ;;  %s21_s29 = int_to_ptr.vmem [resolvable:$true] %s20_s29  ;;  %s47_s7 = int_to_ptr.hbm [resolvable:$true] %s46_s7 }
   0x7   :  { %23 = dma.hbm_to_vmem [thread:$0]  %s19_s25, 64, %s21_s29, [#allocation3]  }
   0x8   :  { %s372_s1 = smov [#allocation7]  }
   0x9   :  { %s48_s8 = sshll.u32 %s372_s1, 4  ;;  %s49_s8 = int_to_ptr.vmem [resolvable:$true] %s48_s8 }
   0xa   :  { %51 = dma.hbm_to_vmem [thread:$0]  %s47_s7, 64, %s49_s8, [#allocation6]  }
   0xb   :  { %362 = dma.done.wait [#allocation3], 64  }
   0xc   :  { %363 = vsyncadd [#allocation3], 4294967232 }
   0xd   :  { %364 = dma.done.wait [#allocation6], 1088  }
   0xe   :  { %365 = vsyncadd [#allocation6], 4294966208  ;;  %v252_v0 = vld [vmem:[#allocation5 + $0x38] sm:$0xff]  ;;  %v251_v1 = vld [vmem:[#allocation5 + $0x30] sm:$0xff]  ;;  %v373_v9 = vmov 8.0   ;;  %s374_s11 = smov [#allocation8]  }
   0xf   :  { %129 = vmatpush.bf16.msra.mxu0 %v252_v0  ;;  %v250_v2 = vld [vmem:[#allocation5 + $0x28] sm:$0xff]  ;;  %v249_v3 = vld [vmem:[#allocation5 + $0x20] sm:$0xff]  ;;  %v248_v4 = vld [vmem:[#allocation5 + $0x18] sm:$0xff]  ;;  %262 = vrcp.f32 %v373_v9  ;;  %s200_s12 = sshll.u32 %s374_s11, 4  ;;  %s202_s15 = sshll.u32 %s428_s5, 4  ;;  %s201_s12 = int_to_ptr.vmem [resolvable:$true] %s200_s12  ;;  %s203_s15 = int_to_ptr.hbm [resolvable:$true] %s202_s15 }
  0x10   :  { %v247_v5 = vld [vmem:[#allocation5 + $0x10] sm:$0xff]  ;;  %v246_v6 = vld [vmem:[#allocation5 + $0x8] sm:$0xff]  ;;  %v245_v7 = vld [vmem:[#allocation5] sm:$0xff] }
  0x11   :  { %v64_v8 = vld [vmem:[#allocation2] sm:$0xf]  ;;  %v189_v40 = vld [vmem:[#allocation7] sm:$0xf] }
  0x12   :  { %v260_v42 = vld [vmem:[%s425_s2] ss:$0 sm:$0xff]  ;;  %v190_v44 = vunpack.c.l.b16 %v189_v40 }
  0x13   :  { %130 = vmatpush.bf16.msra.mxu0 %v251_v1  ;;  %v261_v46 = vld [vmem:[%s426_s3] ss:$0 sm:$0xff] }
  0x14   :  { %v191_v48 = vand.u32 65535, %v190_v44 }
  0x15   :  { %v263_v10 = vpop.eup %262 }
  0x16   :  { %v149_v11 = vmul.f32 8.0, %v263_v10  ;;  %vm153_vm0 = vweird.f32 %v263_v10  ;;  %vm192_vm4 = vcmp.ge.s32.totalorder %v191_v48, 26214 }
  0x17   :  { %131 = vmatpush.bf16.msra.mxu0 %v250_v2 }
  0x18   :  { %v150_v12 = vsub.f32 1.0, %v149_v11 }
  0x1a   :  { %v151_v15 = vmul.f32 %v263_v10, %v150_v12 }
  0x1b   :  { %132 = vmatpush.bf16.msra.mxu0 %v249_v3 }
  0x1c   :  { %v152_v18 = vadd.f32 %v263_v10, %v151_v15 }
  0x1e   :  { %v154_v22 = vsel %vm153_vm0, %v263_v10, %v152_v18 }
  0x1f   :  { %133 = vmatpush.bf16.msra.mxu0 %v248_v4 }
  0x23   :  { %134 = vmatpush.bf16.msra.mxu0 %v247_v5 }
  0x27   :  { %135 = vmatpush.bf16.msra.mxu0 %v246_v6 }
  0x2b   :  { %136 = vmatpush.bf16.msra.mxu0 %v245_v7 }
  0x2e   :  { %137 = vmatmul.bf16.vlgmr.msra.gmra.mxu0 %v64_v8 }
  0xab   :  { %v138_v13 = vpop.f32.mrf.mxu0 }
  0xac   :  { %v142_v14 = vrot.slane %v138_v13, 4 }
  0xae   :  { %v143_v16 = vadd.f32 %v142_v14, %v138_v13 }
  0xb0   :  { %v144_v17 = vrot.slane %v143_v16, 2 }
  0xb2   :  { %v145_v19 = vadd.f32 %v144_v17, %v143_v16 }
  0xb3   :  { %v140_v20 = vpop.f32.mrf.mxu0 }
  0xb4   :  { %v146_v21 = vrot.slane %v145_v19, 1 }
  0xb6   :  { %v147_v23 = vadd.f32 %v146_v21, %v145_v19 }
  0xb8   :  { %v155_v24 = vmul.f32 %v154_v22, %v147_v23 }
  0xba   :  { %v156_v25 = vsub.f32 %v138_v13, %v155_v24 }
  0xbc   :  { %v157_v26 = vmul.f32 %v156_v25, %v156_v25 }
  0xbe   :  { %v158_v27 = vrot.slane %v157_v26, 4 }
  0xc0   :  { %v159_v28 = vadd.f32 %v158_v27, %v157_v26 }
  0xc2   :  { %v160_v29 = vrot.slane %v159_v28, 2 }
  0xc4   :  { %v161_v30 = vadd.f32 %v160_v29, %v159_v28 }
  0xc6   :  { %v162_v31 = vrot.slane %v161_v30, 1 }
  0xc8   :  { %v163_v32 = vadd.f32 %v162_v31, %v161_v30 }
  0xca   :  { %v164_v33 = vmul.f32 %v163_v32, %v154_v22 }
  0xcc   :  { %v165_v34 = vadd.f32 1e-05, %v164_v33 }
  0xce   :  { %264 = vrsqrt.f32 %v165_v34  ;;  %vm172_vm2 = vweird.f32 %v165_v34 }
  0xd4   :  { %v265_v35 = vpop.eup %264 }
  0xd5   :  { %v167_v36 = vmul.f32 %v265_v35, %v165_v34  ;;  %vm173_vm1 = vweird.f32 %v265_v35 }
  0xd6   :  { %vm174_vm3 = vmor %vm172_vm2, %vm173_vm1 }
  0xd7   :  { %v168_v37 = vmul.f32 %v265_v35, %v167_v36 }
  0xd9   :  { %v169_v38 = vmul.f32 0.5, %v168_v37 }
  0xdb   :  { %v170_v39 = vsub.f32 1.5, %v169_v38 }
  0xdd   :  { %v171_v41 = vmul.f32 %v265_v35, %v170_v39 }
  0xdf   :  { %v175_v43 = vsel %vm174_vm3, %v265_v35, %v171_v41 }
  0xe0   :  { %v176_v45 = vmul.f32 %v175_v43, %v156_v25 }
  0xe2   :  { %v181_v47 = vmul.f32 %v260_v42, %v176_v45 }
  0xe4   :  { %v186_v49 = vadd.f32 %v261_v46, %v181_v47 }
  0xe6   :  { %v187_v50 = vmul.f32 0.01, %v186_v49 }
  0xe8   :  { %v188_v51 = vmax.f32 %v186_v49, %v187_v50 }
  0xea   :  { %v193_v52 = vsel %vm192_vm4, %v188_v51, 0.0 }
  0xeb   :  { %194 = vst [vmem:[#allocation8] sm:$0xff] %v193_v52 }
  0xec   :  { %205 = dma.vmem_to_hbm [thread:$0]  %s201_s12, 128, %s203_s15, [#allocation4]  }
  0xed   :  { %366 = dma.done.wait [#allocation4], 128  }
  0xee   :  { %367 = vsyncadd [#allocation4], 4294967168 }
  0xef   :  { %210 = vsyncpa [#allocation3], 1 }
  0xf0   :  { %211 = vsyncpa [#allocation6], 1 }
  0xf1   :  { %212 = vsyncpa [#allocation4], 1 }

</bundles_post_ra>
